<compile_context>
chip_gen: v6e
topology: v6e:2x2x1
jax: 0.10.0
libtpu: 0.0.40
codegen_flags: <defaults>
</compile_context>

<pallas_src>
import math
import functools

import jax
import jax.numpy as jnp
from jax import lax
from jax.experimental import pallas as pl
from jax.experimental.pallas import tpu as pltpu


# ------------------------- pad-amount computation (glue) -------------------------

def _compute_pads(in_shape, size, offset):
    """Return [(left, right), ...] for the last len(size) dims, forward order."""
    k = len(size)
    if isinstance(offset, int):
        offset = (offset,) * k
    assert len(offset) == k
    pads = []
    for j in range(k):
        n_in = in_shape[len(in_shape) - k + j]
        s_out = size[j]
        excess = (s_out - n_in) / 2.0
        left = math.floor(excess) - offset[j]
        right = math.ceil(excess) + offset[j]
        pads.append((int(left), int(right)))
    return pads


def _overlap(n_in, n_out, left_pad):
    """Static dest/source offsets + copy length for one padded/cropped dim."""
    dst0 = max(left_pad, 0)
    src0 = max(-left_pad, 0)
    length = max(min(n_in - src0, n_out - dst0), 0)
    return dst0, src0, length


def _round_up(x, m):
    return -(-x // m) * m


def _vmem_block_bytes(b, h, w, itemsize):
    """Conservative VMEM footprint of a (b, h, w) block incl. (8, 128) tiling."""
    return b * _round_up(h, 8) * _round_up(w, 128) * max(itemsize, 4)


# VMEM sizing knobs (bytes).
_PAIR_BUDGET = 6 * 1024 * 1024         # in-block + out-block per pipeline step
_SAFE_DEFAULT_VMEM = 16 * 1024 * 1024  # most conservative scoped default (v5e)
_MAX_VMEM_LIMIT = 48 * 1024 * 1024     # headroom below v7x's 64 MiB physical VMEM


# --------------------------------- Pallas kernel ---------------------------------

def _center_pad_kernel(x_ref, o_ref, *, dst_h0, ch, dst_w0, cw, value):
    # x_ref: (B, ch, cw)        VMEM (already cropped to the overlap window)
    # o_ref: (B, H_out, W_out)  VMEM
    b, h_out, w_out = o_ref.shape
    dt = o_ref.dtype

    # Interior: copied exactly once. For a pure crop this covers the whole block
    # and no fill stores are emitted at all.
    o_ref[:, dst_h0:dst_h0 + ch, dst_w0:dst_w0 + cw] = x_ref[...]

    # Constant border strips (static Python conditionals -> only non-empty strips
    # generate stores; each output element is written exactly once).
    if dst_h0 > 0:                                   # top rows
        o_ref[:, :dst_h0, :] = jnp.full((b, dst_h0, w_out), value, dtype=dt)
    if dst_h0 + ch < h_out:                          # bottom rows
        nb = h_out - (dst_h0 + ch)
        o_ref[:, dst_h0 + ch:, :] = jnp.full((b, nb, w_out), value, dtype=dt)
    if dst_w0 > 0:                                   # left cols of interior rows
        o_ref[:, dst_h0:dst_h0 + ch, :dst_w0] = jnp.full((b, ch, dst_w0), value, dtype=dt)
    if dst_w0 + cw < w_out:                          # right cols of interior rows
        nr = w_out - (dst_w0 + cw)
        o_ref[:, dst_h0:dst_h0 + ch, dst_w0 + cw:] = jnp.full((b, ch, nr), value, dtype=dt)


def center_pad_pallas(x, size, offset=0, mode="constant", value=0.0):
    """Pallas equivalent of uda.transforms.center_pad (constant mode, 2 spatial dims)."""
    assert mode == "constant"  # TODO(synk): 'reflect'/'replicate' pad modes not implemented.
    assert len(size) == 2 and x.ndim >= 2, "kernel pads/crops the last two dims"

    lead = tuple(int(d) for d in x.shape[:-2])
    H_in, W_in = int(x.shape[-2]), int(x.shape[-1])
    (lh, _rh), (lw, _rw) = _compute_pads(x.shape, size, offset)
    H_out, W_out = H_in + lh + _rh, W_in + lw + _rw
    assert H_out > 0 and W_out > 0

    dst_h0, src_h0, ch = _overlap(H_in, H_out, lh)
    dst_w0, src_w0, cw = _overlap(W_in, W_out, lw)

    out_shape_full = lead + (H_out, W_out)
    dtype = x.dtype

    # Degenerate case: input and output windows do not overlap -> pure fill.
    if ch == 0 or cw == 0:
        return jnp.full(out_shape_full, value, dtype=dtype)

    # Crop fast path: slice off rows/cols that never reach the output so they are
    # never DMA'd into VMEM by the kernel.
    if (src_h0, ch) != (0, H_in) or (src_w0, cw) != (0, W_in):
        start = (0,) * len(lead) + (src_h0, src_w0)
        limit = lead + (src_h0 + ch, src_w0 + cw)
        x = lax.slice(x, start, limit)

    # Collapse all leading dims into one "plane" axis (free, row-major reshape).
    nc = 1
    for d in lead:
        nc *= d
    x3 = x.reshape(nc, ch, cw)

    # Choose how many whole planes one grid step processes, under a VMEM budget.
    itemsize = jnp.dtype(dtype).itemsize
    pair_bytes = (_vmem_block_bytes(1, ch, cw, itemsize)
                  + _vmem_block_bytes(1, H_out, W_out, itemsize))
    b = int(max(1, min(nc, _PAIR_BUDGET // pair_bytes)))
    grid = (pl.cdiv(nc, b),)

    # Double-buffered footprint; raise the scoped VMEM limit only if needed.
    vmem_needed = 2 * b * pair_bytes + (1 << 20)
    compiler_kwargs = dict(dimension_semantics=("parallel",))
    if vmem_needed > _SAFE_DEFAULT_VMEM:
        compiler_kwargs["vmem_limit_bytes"] = int(min(_MAX_VMEM_LIMIT, vmem_needed))
    # TODO(synk): planes too large for a single (1, H, W) in+out pair in VMEM would
    # additionally need H-tiling (element-offset index maps / manual DMA).

    kernel = functools.partial(
        _center_pad_kernel,
        dst_h0=dst_h0, ch=ch, dst_w0=dst_w0, cw=cw, value=value,
    )

    out3 = pl.pallas_call(
        kernel,
        out_shape=jax.ShapeDtypeStruct((nc, H_out, W_out), dtype),
        grid=grid,
        in_specs=[pl.BlockSpec((b, ch, cw), lambda i: (i, 0, 0))],
        out_specs=pl.BlockSpec((b, H_out, W_out), lambda i: (i, 0, 0)),
        compiler_params=pltpu.CompilerParams(**compiler_kwargs),
    )(x3)
    return out3.reshape(out_shape_full)


# ------------------------------ pure-JAX reference ------------------------------

def center_pad_ref(x, size, offset=0, value=0.0):
    pads = _compute_pads(x.shape, size, offset)
    full = [(0, 0)] * (x.ndim - len(size)) + pads
    pos = [(max(l, 0), max(r, 0)) for l, r in full]
    y = jnp.pad(x, pos, constant_values=value)
    slices = []
    for (l, r), s in zip(full, y.shape):
        slices.append(slice(max(-l, 0), s - max(-r, 0)))
    return y[tuple(slices)]


# -------------------------------------- main --------------------------------------

if __name__ == "__main__":
    key = jax.random.PRNGKey(0)
    x = jax.random.normal(key, (2, 4, 16, 16), dtype=jnp.float32)

    # Case 1: pure padding with per-dim offset (CenterPad(24, 20, offset=(1, -2)))
    out1 = jax.block_until_ready(center_pad_pallas(x, (24, 20), offset=(1, -2), value=0.0))
    ref1 = center_pad_ref(x, (24, 20), offset=(1, -2), value=0.0)
    assert out1.shape == (2, 4, 24, 20)
    assert jnp.allclose(out1, ref1)

    # Case 2: mixed crop (H) + pad (W) with nonzero fill value (CenterPad(12, 20, value=-1))
    out2 = jax.block_until_ready(center_pad_pallas(x, (12, 20), offset=0, value=-1.0))
    ref2 = center_pad_ref(x, (12, 20), offset=0, value=-1.0)
    assert out2.shape == (2, 4, 12, 20)
    assert jnp.allclose(out2, ref2)

    # Case 3: pure crop in both dims (CenterPad(8, 8)) -> single-copy fast path.
    out3 = jax.block_until_ready(center_pad_pallas(x, (8, 8), offset=0, value=0.0))
    ref3 = center_pad_ref(x, (8, 8), offset=0, value=0.0)
    assert out3.shape == (2, 4, 8, 8)
    assert jnp.allclose(out3, ref3)

    print("KERNEL_OK")
</pallas_src>

<mosaic_0001>
module attributes {stable_mosaic.version = 11 : i64} {
  func.func @_center_pad_kernel(%arg0: i32, %arg1: memref<8x16x16xf32, #tpu.memory_space<vmem>>, %arg2: memref<8x24x20xf32, #tpu.memory_space<vmem>>) attributes {dimension_semantics = [#tpu.dimension_semantics<parallel>], iteration_bounds = array<i64: 1>, scalar_prefetch = 0 : i64, scratch_operands = 0 : i64, tpu.core_type = #tpu.core_type<tc>, window_params = [{transform_indices = @transform_0, window_bounds = array<i64: 8, 16, 16>}, {transform_indices = @transform_1, window_bounds = array<i64: 8, 24, 20>}]} {
    %c0 = arith.constant 0 : index
    %c0_0 = arith.constant 0 : index
    %c0_1 = arith.constant 0 : index
    %0 = vector.load %arg1[%c0, %c0_0, %c0_1] : memref<8x16x16xf32, #tpu.memory_space<vmem>>, vector<8x16x16xf32>
    %c0_2 = arith.constant 0 : index
    %c3 = arith.constant 3 : index
    %c4 = arith.constant 4 : index
    %1 = vector.load %arg2[%c0_2, %c3, %c4] : memref<8x24x20xf32, #tpu.memory_space<vmem>>, vector<8x16x16xf32>
    tpu.vector_store %arg2[%c0_2, %c3, %c4], %0 {strides = array<i32>} : memref<8x24x20xf32, #tpu.memory_space<vmem>>, vector<8x16x16xf32>,
    %cst = arith.constant 0.000000e+00 : f32
    %2 = vector.broadcast %cst : f32 to vector<8x3x20xf32>
    %c0_3 = arith.constant 0 : index
    %c0_4 = arith.constant 0 : index
    %c0_5 = arith.constant 0 : index
    %3 = vector.load %arg2[%c0_3, %c0_4, %c0_5] : memref<8x24x20xf32, #tpu.memory_space<vmem>>, vector<8x3x20xf32>
    tpu.vector_store %arg2[%c0_3, %c0_4, %c0_5], %2 {strides = array<i32>} : memref<8x24x20xf32, #tpu.memory_space<vmem>>, vector<8x3x20xf32>,
    %cst_6 = arith.constant 0.000000e+00 : f32
    %4 = vector.broadcast %cst_6 : f32 to vector<8x5x20xf32>
    %c0_7 = arith.constant 0 : index
    %c19 = arith.constant 19 : index
    %c0_8 = arith.constant 0 : index
    %5 = vector.load %arg2[%c0_7, %c19, %c0_8] : memref<8x24x20xf32, #tpu.memory_space<vmem>>, vector<8x5x20xf32>
    tpu.vector_store %arg2[%c0_7, %c19, %c0_8], %4 {strides = array<i32>} : memref<8x24x20xf32, #tpu.memory_space<vmem>>, vector<8x5x20xf32>,
    %cst_9 = arith.constant 0.000000e+00 : f32
    %6 = vector.broadcast %cst_9 : f32 to vector<8x16x4xf32>
    %c0_10 = arith.constant 0 : index
    %c3_11 = arith.constant 3 : index
    %c0_12 = arith.constant 0 : index
    %7 = vector.load %arg2[%c0_10, %c3_11, %c0_12] : memref<8x24x20xf32, #tpu.memory_space<vmem>>, vector<8x16x4xf32>
    tpu.vector_store %arg2[%c0_10, %c3_11, %c0_12], %6 {strides = array<i32>} : memref<8x24x20xf32, #tpu.memory_space<vmem>>, vector<8x16x4xf32>,
    return
  }
  func.func @transform_0(%arg0: i32) -> (i32, i32, i32) {
    %c0_i32 = arith.constant 0 : i32
    %c0_i32_0 = arith.constant 0 : i32
    %c0_i32_1 = arith.constant 0 : i32
    return %arg0, %c0_i32, %c0_i32_0 : i32, i32, i32
  }
  func.func @transform_1(%arg0: i32) -> (i32, i32, i32) {
    %c0_i32 = arith.constant 0 : i32
    %c0_i32_0 = arith.constant 0 : i32
    %c0_i32_1 = arith.constant 0 : i32
    return %arg0, %c0_i32, %c0_i32_0 : i32, i32, i32
  }
}

</mosaic_0001>

<bundles_post_ra>
// kernel: tpu_custom_call.1
= control target key start
LH: loop header
LB: loop body
LE: loop exit
PB: predicated region body
PF: predicated region fallthrough
CT: control target
= control target key end

     0   :  { %6 = vsyncpa [#allocation3], 0  ;;  %s186_s6 = smov [#allocation2]   ;;  %s412_s0 = inlined_call_operand.hbm [shape: f32[8,16,16], index: 0, kind: input, shape index: {}]   ;;  %s413_s1 = inlined_call_operand.vmem [shape: f32[8,24,20], index: 1, kind: output, shape index: {}]  }
   0x1   :  { %s12_s7 = sshll.u32 %s186_s6, 4  ;;  %s13_s7 = int_to_ptr.vmem [resolvable:$true] %s12_s7 }
   0x2   :  { %s172_s8 = scalar_lea.vmem %s13_s7, 2048  ;;  %p177_p1 = scmp.lt.s32.totalorder %s13_s7, %s13_s7 }
   0x3   :  { %p173_p0 = scmp.ne.s32.totalorder %s13_s7, %s172_s8  ;;  %p178_p2 = scmp.lt.s32.totalorder %s172_s8, %s172_s8 }
   0x5   :  { %p179_p3 = por %p178_p2, %p177_p1 }
   0x7   :  { %p180_p4 = pnand %p179_p3, %p173_p0 }
   0x9   :  { %183 = shalt.err (!%p180_p4)
}
   0xa   :  { %s187_s9 = smov 128   ;;  %s188_s10 = smov 8  }
   0xb   :  { %18 = dma.hbm_to_vmem [thread:$0]  %s412_s0, 2048, %s13_s7, [#allocation3], %s187_s9, %s187_s9, %s188_s10  }
   0xc   :  { %184 = dma.done.wait [#allocation3], 2048  }
   0xd   :  { %185 = vsyncadd [#allocation3], 4294965248  ;;  %vm119_vm0 = vcmask 157696   ;;  %v189_v0 = vmov 0.0   ;;  %vm128_vm1 = vcmask 159744   ;;  %v24_v1 = vld [vmem:[#allocation2 + $0x10] sm:$0xff] }
   0xe   :  { %120 = vst.msk [vmem:[%s413_s1] sm:$0x7] %vm119_vm0, %v189_v0  ;;  %121 = vst.msk [vmem:[%s413_s1 + $0x18] sm:$0x7] %vm119_vm0, %v189_v0  ;;  %v22_v2 = vld [vmem:[#allocation2] sm:$0xff]  ;;  %s190_s15 = smov 4  }
   0xf   :  { %122 = vst.msk [vmem:[%s413_s1 + $0x30] sm:$0x7] %vm119_vm0, %v189_v0  ;;  %123 = vst.msk [vmem:[%s413_s1 + $0x48] sm:$0x7] %vm119_vm0, %v189_v0  ;;  %58 = vrot.lane.b32.xlu1 %v24_v1, %s190_s15  ;;  %54 = vrot.lane.b32.xlu0 %v22_v2, %s190_s15  ;;  %v25_v3 = vld [vmem:[#allocation2 + $0x18] sm:$0xff]  ;;  %v23_v4 = vld [vmem:[#allocation2 + $0x8] sm:$0xff] }
  0x10   :  { %124 = vst.msk [vmem:[%s413_s1 + $0x60] sm:$0x7] %vm119_vm0, %v189_v0  ;;  %125 = vst.msk [vmem:[%s413_s1 + $0x78] sm:$0x7] %vm119_vm0, %v189_v0  ;;  %v27_v5 = vld [vmem:[#allocation2 + $0x28] sm:$0xff]  ;;  %v26_v6 = vld [vmem:[#allocation2 + $0x20] sm:$0xff] }
  0x11   :  { %126 = vst.msk [vmem:[%s413_s1 + $0x90] sm:$0x7] %vm119_vm0, %v189_v0  ;;  %127 = vst.msk [vmem:[%s413_s1 + $0xa8] sm:$0x7] %vm119_vm0, %v189_v0  ;;  %v29_v7 = vld [vmem:[#allocation2 + $0x38] sm:$0xff]  ;;  %v28_v8 = vld [vmem:[#allocation2 + $0x30] sm:$0xff] }
  0x12   :  { %129 = vst.msk [vmem:[%s413_s1 + $0x13] sm:$0x1f] %vm128_vm1, %v189_v0  ;;  %130 = vst.msk [vmem:[%s413_s1 + $0x2b] sm:$0x1f] %vm128_vm1, %v189_v0  ;;  %v31_v9 = vld [vmem:[#allocation2 + $0x48] sm:$0xff]  ;;  %v30_v10 = vld [vmem:[#allocation2 + $0x40] sm:$0xff] }
  0x13   :  { %131 = vst.msk [vmem:[%s413_s1 + $0x43] sm:$0x1f] %vm128_vm1, %v189_v0  ;;  %132 = vst.msk [vmem:[%s413_s1 + $0x5b] sm:$0x1f] %vm128_vm1, %v189_v0  ;;  %60 = vrot.lane.b32.xlu1 %v25_v3, %s190_s15  ;;  %56 = vrot.lane.b32.xlu0 %v23_v4, %s190_s15  ;;  %v33_v11 = vld [vmem:[#allocation2 + $0x58] sm:$0xff]  ;;  %v32_v12 = vld [vmem:[#allocation2 + $0x50] sm:$0xff] }
  0x14   :  { %133 = vst.msk [vmem:[%s413_s1 + $0x73] sm:$0x1f] %vm128_vm1, %v189_v0  ;;  %134 = vst.msk [vmem:[%s413_s1 + $0x8b] sm:$0x1f] %vm128_vm1, %v189_v0  ;;  %v35_v13 = vld [vmem:[#allocation2 + $0x68] sm:$0xff]  ;;  %v34_v14 = vld [vmem:[#allocation2 + $0x60] sm:$0xff] }
  0x15   :  { %135 = vst.msk [vmem:[%s413_s1 + $0xa3] sm:$0x1f] %vm128_vm1, %v189_v0  ;;  %136 = vst.msk [vmem:[%s413_s1 + $0xbb] sm:$0x1f] %vm128_vm1, %v189_v0  ;;  %v37_v15 = vld [vmem:[#allocation2 + $0x78] sm:$0xff]  ;;  %v36_v16 = vld [vmem:[#allocation2 + $0x70] sm:$0xff] }
  0x16   :  { %vm102_vm2 = vcmask 162848   ;;  %vm137_vm3 = vcmask 31744  }
  0x17   :  { %64 = vrot.lane.b32.xlu1 %v27_v5, %s190_s15  ;;  %62 = vrot.lane.b32.xlu0 %v26_v6, %s190_s15 }
  0x1b   :  { %68 = vrot.lane.b32.xlu1 %v29_v7, %s190_s15  ;;  %66 = vrot.lane.b32.xlu0 %v28_v8, %s190_s15 }
  0x1f   :  { %72 = vrot.lane.b32.xlu1 %v31_v9, %s190_s15  ;;  %70 = vrot.lane.b32.xlu0 %v30_v10, %s190_s15 }
  0x23   :  { %76 = vrot.lane.b32.xlu1 %v33_v11, %s190_s15  ;;  %74 = vrot.lane.b32.xlu0 %v32_v12, %s190_s15 }
  0x27   :  { %80 = vrot.lane.b32.xlu1 %v35_v13, %s190_s15  ;;  %78 = vrot.lane.b32.xlu0 %v34_v14, %s190_s15 }
  0x2b   :  { %84 = vrot.lane.b32.xlu1 %v37_v15, %s190_s15  ;;  %82 = vrot.lane.b32.xlu0 %v36_v16, %s190_s15 }
  0x81   :  { %v59_v17 = vpop.permute.xlu1 %58  ;;  %v55_v18 = vpop.permute.xlu0 %54 }
  0x82   :  { %105 = vst.msk [vmem:[%s413_s1 + $0x1b] sm:$0xff] %vm102_vm2, %v59_v17  ;;  %103 = vst.msk [vmem:[%s413_s1 + $0x3] sm:$0xff] %vm102_vm2, %v55_v18 }
  0x83   :  { %140 = vst.msk [vmem:[%s413_s1 + $0x1b] sm:$0xff] %vm137_vm3, %v189_v0  ;;  %138 = vst.msk [vmem:[%s413_s1 + $0x3] sm:$0xff] %vm137_vm3, %v189_v0 }
  0x85   :  { %v61_v19 = vpop.permute.xlu1 %60  ;;  %v57_v20 = vpop.permute.xlu0 %56 }
  0x86   :  { %106 = vst.msk [vmem:[%s413_s1 + $0x23] sm:$0xff] %vm102_vm2, %v61_v19  ;;  %104 = vst.msk [vmem:[%s413_s1 + $0xb] sm:$0xff] %vm102_vm2, %v57_v20 }
  0x87   :  { %141 = vst.msk [vmem:[%s413_s1 + $0x23] sm:$0xff] %vm137_vm3, %v189_v0  ;;  %139 = vst.msk [vmem:[%s413_s1 + $0xb] sm:$0xff] %vm137_vm3, %v189_v0 }
  0x89   :  { %v65_v21 = vpop.permute.xlu1 %64  ;;  %v63_v22 = vpop.permute.xlu0 %62 }
  0x8a   :  { %108 = vst.msk [vmem:[%s413_s1 + $0x3b] sm:$0xff] %vm102_vm2, %v65_v21  ;;  %107 = vst.msk [vmem:[%s413_s1 + $0x33] sm:$0xff] %vm102_vm2, %v63_v22 }
  0x8b   :  { %143 = vst.msk [vmem:[%s413_s1 + $0x3b] sm:$0xff] %vm137_vm3, %v189_v0  ;;  %142 = vst.msk [vmem:[%s413_s1 + $0x33] sm:$0xff] %vm137_vm3, %v189_v0 }
  0x8d   :  { %v69_v23 = vpop.permute.xlu1 %68  ;;  %v67_v24 = vpop.permute.xlu0 %66 }
  0x8e   :  { %110 = vst.msk [vmem:[%s413_s1 + $0x53] sm:$0xff] %vm102_vm2, %v69_v23  ;;  %109 = vst.msk [vmem:[%s413_s1 + $0x4b] sm:$0xff] %vm102_vm2, %v67_v24 }
  0x8f   :  { %145 = vst.msk [vmem:[%s413_s1 + $0x53] sm:$0xff] %vm137_vm3, %v189_v0  ;;  %144 = vst.msk [vmem:[%s413_s1 + $0x4b] sm:$0xff] %vm137_vm3, %v189_v0 }
  0x91   :  { %v73_v25 = vpop.permute.xlu1 %72  ;;  %v71_v26 = vpop.permute.xlu0 %70 }
  0x92   :  { %112 = vst.msk [vmem:[%s413_s1 + $0x6b] sm:$0xff] %vm102_vm2, %v73_v25  ;;  %111 = vst.msk [vmem:[%s413_s1 + $0x63] sm:$0xff] %vm102_vm2, %v71_v26 }
  0x93   :  { %147 = vst.msk [vmem:[%s413_s1 + $0x6b] sm:$0xff] %vm137_vm3, %v189_v0  ;;  %146 = vst.msk [vmem:[%s413_s1 + $0x63] sm:$0xff] %vm137_vm3, %v189_v0 }
  0x95   :  { %v77_v27 = vpop.permute.xlu1 %76  ;;  %v75_v28 = vpop.permute.xlu0 %74 }
  0x96   :  { %114 = vst.msk [vmem:[%s413_s1 + $0x83] sm:$0xff] %vm102_vm2, %v77_v27  ;;  %113 = vst.msk [vmem:[%s413_s1 + $0x7b] sm:$0xff] %vm102_vm2, %v75_v28 }
  0x97   :  { %149 = vst.msk [vmem:[%s413_s1 + $0x83] sm:$0xff] %vm137_vm3, %v189_v0  ;;  %148 = vst.msk [vmem:[%s413_s1 + $0x7b] sm:$0xff] %vm137_vm3, %v189_v0 }
  0x99   :  { %v81_v29 = vpop.permute.xlu1 %80  ;;  %v79_v30 = vpop.permute.xlu0 %78 }
  0x9a   :  { %116 = vst.msk [vmem:[%s413_s1 + $0x9b] sm:$0xff] %vm102_vm2, %v81_v29  ;;  %115 = vst.msk [vmem:[%s413_s1 + $0x93] sm:$0xff] %vm102_vm2, %v79_v30 }
  0x9b   :  { %151 = vst.msk [vmem:[%s413_s1 + $0x9b] sm:$0xff] %vm137_vm3, %v189_v0  ;;  %150 = vst.msk [vmem:[%s413_s1 + $0x93] sm:$0xff] %vm137_vm3, %v189_v0 }
  0x9d   :  { %v85_v31 = vpop.permute.xlu1 %84  ;;  %v83_v32 = vpop.permute.xlu0 %82 }
  0x9e   :  { %118 = vst.msk [vmem:[%s413_s1 + $0xb3] sm:$0xff] %vm102_vm2, %v85_v31  ;;  %117 = vst.msk [vmem:[%s413_s1 + $0xab] sm:$0xff] %vm102_vm2, %v83_v32 }
  0x9f   :  { %153 = vst.msk [vmem:[%s413_s1 + $0xb3] sm:$0xff] %vm137_vm3, %v189_v0  ;;  %152 = vst.msk [vmem:[%s413_s1 + $0xab] sm:$0xff] %vm137_vm3, %v189_v0 }
  0xa0   :  { %158 = vsyncpa [#allocation3], 1 }

</bundles_post_ra>
